<compile_context>
chip_gen: v6e
topology: v6e:2x2x1
jax: 0.10.0
libtpu: 0.0.40
codegen_flags: <defaults>
</compile_context>

<pallas_src>
import jax
import jax.numpy as jnp
from jax import lax
from jax.experimental import pallas as pl
from jax.experimental.pallas import tpu as pltpu


def _cdiv(a, b):
    return -(-a // b)


def _round_up(n, m):
    return _cdiv(n, m) * m


def _linear_kernel(x_ref, w_ref, b_ref, o_ref, acc_ref):
    """One (batch-tile, feature-tile) step of y = x @ w + b.

    x_ref:   (TB, TK)  streamed activation tile (compute dtype)
    w_ref:   (1, TK)   weight row tile (compute dtype, VMEM-resident when nk==1)
    b_ref:   (1,)      bias scalar, f32, SMEM
    o_ref:   (1, TB)   lane-dense output row tile
    acc_ref: (1, TB)   f32 accumulator scratch (persists across the k axis)
    """
    k = pl.program_id(1)

    @pl.when(k == 0)
    def _init():
        acc_ref[...] = jnp.zeros_like(acc_ref)

    # (1, TK) . (TB, TK) contracting the lane (feature) dim of both -> (1, TB).
    # Result stays lane-dense so the output store is an unmasked vst and the
    # output VMEM buffer is 8 sublanes tall instead of a 128-lane-padded (TB,1).
    # TODO(synk): if the Mosaic lowering of this contraction relayouts the full
    # (TB, TK) x tile, switch to x @ w^T -> (TB, 1) and store a column instead.
    acc_ref[...] += lax.dot_general(
        w_ref[...], x_ref[...],
        dimension_numbers=(((1,), (1,)), ((), ())),
        preferred_element_type=jnp.float32,
    )

    @pl.when(k == pl.num_programs(1) - 1)
    def _finalize():
        o_ref[...] = (acc_ref[...] + b_ref[0]).astype(o_ref.dtype)


_TARGET_TILE_BYTES = 8 * 1024 * 1024   # per x VMEM buffer (lane-padded footprint)
_MIN_ROWS = 128                        # smallest batch tile we ever use when tiling


def net_forward(x, weights, bias):
    """Pallas equivalent of Net.forward: torch.matmul(x, weights) + bias.

    x: [B, F], weights: [F], bias: [1]  ->  returns [B]
    """
    x = jnp.asarray(x)
    B, F = x.shape
    compute_dtype = x.dtype
    itemsize = jnp.dtype(compute_dtype).itemsize
    w_row = jnp.asarray(weights).reshape(1, F).astype(compute_dtype)
    b_scalar = jnp.asarray(bias).reshape(1).astype(jnp.float32)

    # Sublane packing: 8 rows (f32), 16 (bf16), 32 (int8) per (., 128) tile group.
    pack = 8 * max(1, 4 // itemsize)

    # ---- Feature (K) tiling: only split when even a 128-row tile blows the budget.
    if _MIN_ROWS * _round_up(F, 128) * itemsize <= _TARGET_TILE_BYTES:
        TK = F
    else:
        tk_budget = max(128, (_TARGET_TILE_BYTES // (_MIN_ROWS * itemsize)) // 128 * 128)
        TK = 0
        for cand in range(tk_budget, 0, -128):
            if F % cand == 0:
                TK = cand
                break
        if TK == 0:
            # TODO(synk): mask the ragged feature tail in-kernel so K-tiling also
            # covers F with no 128-aligned divisor; fall back to one big tile.
            TK = F
    nk = _cdiv(F, TK)
    TK_pad = _round_up(TK, 128)

    # ---- Batch tiling: biggest lane-padded tile under the budget (multiple of
    # 128), and for B > 128 keep TB <= ~ceil(B/2) so the grid has >= 2 batch
    # steps and both v7x TensorCores get work.
    row_bytes = TK_pad * itemsize
    tb_cap = max(128, (_TARGET_TILE_BYTES // row_bytes) // 128 * 128)
    if B <= 128:
        TB = B                      # single block == full (possibly ragged) array
    else:
        TB = max(128, min(tb_cap, _round_up(_cdiv(B, 2), 128)))
    nb = _cdiv(B, TB)

    # ---- VMEM budget with lane/sublane padding; explicit limit with headroom.
    x_tile_bytes = _round_up(TB, pack) * TK_pad * itemsize
    w_tile_bytes = pack * TK_pad * itemsize
    out_tile_bytes = 8 * _round_up(TB, 128) * itemsize
    acc_bytes = 8 * _round_up(TB, 128) * 4
    vmem_need = 2 * x_tile_bytes + 2 * w_tile_bytes + 2 * out_tile_bytes + acc_bytes
    vmem_limit = int(min(48 * 2**20, max(32 * 2**20, vmem_need + 8 * 2**20)))

    out = pl.pallas_call(
        _linear_kernel,
        out_shape=jax.ShapeDtypeStruct((1, B), compute_dtype),
        grid_spec=pltpu.PrefetchScalarGridSpec(
            num_scalar_prefetch=0,
            grid=(nb, nk),
            in_specs=[
                pl.BlockSpec((TB, TK), lambda i, k: (i, k)),          # streamed x tiles
                pl.BlockSpec((1, TK), lambda i, k: (0, k)),           # weight row
                pl.BlockSpec(memory_space=pltpu.MemorySpace.SMEM),    # bias scalar in SMEM
            ],
            out_specs=pl.BlockSpec((1, TB), lambda i, k: (0, i)),     # lane-dense output row
            scratch_shapes=[pltpu.VMEM((1, TB), jnp.float32)],        # f32 accumulator
        ),
        compiler_params=pltpu.CompilerParams(
            dimension_semantics=("parallel", "arbitrary"),  # batch tiles independent
            vmem_limit_bytes=vmem_limit,
        ),
        cost_estimate=pl.CostEstimate(
            flops=2 * B * F,
            transcendentals=0,
            bytes_accessed=B * F * itemsize + F * itemsize + B * itemsize,
        ),
    )(x, w_row, b_scalar)

    return out[0]


def init_params(nfeatures, initialiser="normal", key=None):
    """Deterministic parameter init mirroring Net.__init__ shapes."""
    if initialiser == "zero":
        weights = jnp.zeros((nfeatures,), dtype=jnp.float32)
        bias = jnp.zeros((1,), dtype=jnp.float32)
    elif initialiser == "normal":
        kw, kb = jax.random.split(key)
        weights = 0.1 * jax.random.normal(kw, (nfeatures,), dtype=jnp.float32)
        bias = 0.1 * jax.random.normal(kb, (1,), dtype=jnp.float32)
    else:
        raise ValueError(initialiser)
    return weights, bias


if __name__ == "__main__":
    key = jax.random.PRNGKey(0)
    k_x, k_p, k_x2 = jax.random.split(key, 3)

    # Small case matching the module's toy usage.
    batch, nfeatures = 8, 32
    x = jax.random.normal(k_x, (batch, nfeatures), dtype=jnp.float32)
    weights, bias = init_params(nfeatures, initialiser="normal", key=k_p)

    y = jax.block_until_ready(net_forward(x, weights, bias))
    y_ref = jnp.matmul(x, weights) + bias
    assert y.shape == (batch,)
    assert jnp.allclose(y, y_ref, atol=1e-5, rtol=1e-5)

    # Larger, non-divisible batch: exercises batch tiling + ragged tail block
    # (no host-side padding copy of x).
    batch2 = 2500
    x2 = jax.random.normal(k_x2, (batch2, nfeatures), dtype=jnp.float32)
    y2 = jax.block_until_ready(net_forward(x2, weights, bias))
    y2_ref = jnp.matmul(x2, weights) + bias
    assert y2.shape == (batch2,)
    assert jnp.allclose(y2, y2_ref, atol=1e-5, rtol=1e-5)

    print("KERNEL_OK")
</pallas_src>

<mosaic_0001>
module attributes {stable_mosaic.version = 11 : i64} {
  func.func @_linear_kernel(%arg0: i32, %arg1: i32, %arg2: memref<8x32xf32, #tpu.memory_space<vmem>>, %arg3: memref<1x32xf32, #tpu.memory_space<vmem>>, %arg4: memref<1xf32, #tpu.memory_space<smem>>, %arg5: memref<1x8xf32, #tpu.memory_space<vmem>>, %arg6: memref<1x8xf32, #tpu.memory_space<vmem>>) attributes {dimension_semantics = [#tpu.dimension_semantics<parallel>, #tpu.dimension_semantics<arbitrary>], iteration_bounds = array<i64: 1, 1>, scalar_prefetch = 0 : i64, scratch_operands = 1 : i64, tpu.core_type = #tpu.core_type<tc>, window_params = [{transform_indices = @transform_0, window_bounds = array<i64: 8, 32>}, {transform_indices = @transform_1, window_bounds = array<i64: 1, 32>}, {transform_indices = @transform_2, window_bounds = array<i64: 1>}, {transform_indices = @transform_3, window_bounds = array<i64: 1, 8>}]} {
    %c0_i32 = arith.constant 0 : i32
    %0 = arith.cmpi eq, %arg1, %c0_i32 : i32
    %1 = arith.extui %0 : i1 to i32
    %c0_i32_0 = arith.constant 0 : i32
    %2 = arith.cmpi ne, %1, %c0_i32_0 : i32
    scf.if %2 {
      %cst_10 = arith.constant 0.000000e+00 : f32
      %12 = vector.broadcast %cst_10 : f32 to vector<1x8xf32>
      %c0_11 = arith.constant 0 : index
      %c0_12 = arith.constant 0 : index
      %13 = vector.load %arg6[%c0_11, %c0_12] : memref<1x8xf32, #tpu.memory_space<vmem>>, vector<1x8xf32>
      tpu.vector_store %arg6[%c0_11, %c0_12], %12 {strides = array<i32>} : memref<1x8xf32, #tpu.memory_space<vmem>>, vector<1x8xf32>,
    } else {
    }
    %c0 = arith.constant 0 : index
    %c0_1 = arith.constant 0 : index
    %3 = vector.load %arg6[%c0, %c0_1] : memref<1x8xf32, #tpu.memory_space<vmem>>, vector<1x8xf32>
    %c0_2 = arith.constant 0 : index
    %c0_3 = arith.constant 0 : index
    %4 = vector.load %arg3[%c0_2, %c0_3] : memref<1x32xf32, #tpu.memory_space<vmem>>, vector<1x32xf32>
    %c0_4 = arith.constant 0 : index
    %c0_5 = arith.constant 0 : index
    %5 = vector.load %arg2[%c0_4, %c0_5] : memref<8x32xf32, #tpu.memory_space<vmem>>, vector<8x32xf32>
    %cst = arith.constant dense<0.000000e+00> : vector<1x8xf32>
    %6 = tpu.matmul %4, %5, %cst {dimension_numbers = #tpu.dot_dimension_numbers<[1], [1], [0], [0], [0, 0, 1, 0], [], []>} : vector<1x32xf32>, vector<8x32xf32>, vector<1x8xf32> -> vector<1x8xf32>
    %7 = arith.addf %3, %6 : vector<1x8xf32>
    %c0_6 = arith.constant 0 : index
    %c0_7 = arith.constant 0 : index
    %8 = vector.load %arg6[%c0_6, %c0_7] : memref<1x8xf32, #tpu.memory_space<vmem>>, vector<1x8xf32>
    tpu.vector_store %arg6[%c0_6, %c0_7], %7 {strides = array<i32>} : memref<1x8xf32, #tpu.memory_space<vmem>>, vector<1x8xf32>,
    %c0_i32_8 = arith.constant 0 : i32
    %9 = arith.cmpi eq, %arg1, %c0_i32_8 : i32
    %10 = arith.extui %9 : i1 to i32
    %c0_i32_9 = arith.constant 0 : i32
    %11 = arith.cmpi ne, %10, %c0_i32_9 : i32
    scf.if %11 {
      %c0_10 = arith.constant 0 : index
      %c0_11 = arith.constant 0 : index
      %12 = vector.load %arg6[%c0_10, %c0_11] : memref<1x8xf32, #tpu.memory_space<vmem>>, vector<1x8xf32>
      %c0_12 = arith.constant 0 : index
      %13 = memref.load %arg4[%c0_12] : memref<1xf32, #tpu.memory_space<smem>>
      %14 = vector.broadcast %13 : f32 to vector<1x8xf32>
      %15 = arith.addf %12, %14 : vector<1x8xf32>
      %c0_13 = arith.constant 0 : index
      %c0_14 = arith.constant 0 : index
      %16 = vector.load %arg5[%c0_13, %c0_14] : memref<1x8xf32, #tpu.memory_space<vmem>>, vector<1x8xf32>
      tpu.vector_store %arg5[%c0_13, %c0_14], %15 {strides = array<i32>} : memref<1x8xf32, #tpu.memory_space<vmem>>, vector<1x8xf32>,
    } else {
    }
    return
  }
  func.func @transform_0(%arg0: i32, %arg1: i32) -> (i32, i32) {
    %c0_i32 = arith.constant 0 : i32
    return %arg0, %arg1 : i32, i32
  }
  func.func @transform_1(%arg0: i32, %arg1: i32) -> (i32, i32) {
    %c0_i32 = arith.constant 0 : i32
    %c0_i32_0 = arith.constant 0 : i32
    return %c0_i32, %arg1 : i32, i32
  }
  func.func @transform_2(%arg0: i32, %arg1: i32) -> i32 {
    %c0_i32 = arith.constant 0 : i32
    %c0_i32_0 = arith.constant 0 : i32
    return %c0_i32 : i32
  }
  func.func @transform_3(%arg0: i32, %arg1: i32) -> (i32, i32) {
    %c0_i32 = arith.constant 0 : i32
    %c0_i32_0 = arith.constant 0 : i32
    return %c0_i32, %arg0 : i32, i32
  }
}

</mosaic_0001>

<bundles_post_ra>
// kernel: tpu_custom_call.1
= control target key start
LH: loop header
LB: loop body
LE: loop exit
PB: predicated region body
PF: predicated region fallthrough
CT: control target
= control target key end

     0   :  { %9 = vsyncpa [#allocation5], 0  ;;  %s236_s0 = inlined_call_operand.hbm [shape: f32[8,32], index: 0, kind: input, shape index: {}]   ;;  %s237_s1 = inlined_call_operand.vmem [shape: f32[1,32], index: 1, kind: input, shape index: {}]   ;;  %s238_s2 = inlined_call_operand.<no memory space> [shape: f32[1], index: 2, kind: input, shape index: {}]   ;;  %s239_s3 = inlined_call_operand.hbm [shape: f32[1,8], index: 3, kind: output, shape index: {}]  }
   0x1   :  { %10 = vsyncpa [#allocation6], 0  ;;  %s197_s12 = smov [#allocation4]  }
   0x2   :  { %s17_s13 = sshll.u32 %s197_s12, 4  ;;  %s18_s13 = int_to_ptr.vmem [resolvable:$true] %s17_s13 }
   0x3   :  { %s161_s14 = scalar_lea.vmem %s18_s13, 128  ;;  %p166_p1 = scmp.lt.s32.totalorder %s18_s13, %s18_s13 }
   0x4   :  { %p162_p0 = scmp.ne.s32.totalorder %s18_s13, %s161_s14  ;;  %p167_p2 = scmp.lt.s32.totalorder %s161_s14, %s161_s14 }
   0x6   :  { %p168_p3 = por %p167_p2, %p166_p1 }
   0x8   :  { %p169_p4 = pnand %p168_p3, %p162_p0 }
   0xa   :  { %172 = shalt.err (!%p169_p4)
}
   0xb   :  { %20 = dma.hbm_to_vmem [thread:$0]  %s236_s0, 128, %s18_s13, [#allocation5]  }
   0xc   :  { %193 = dma.done.wait [#allocation5], 128  }
   0xd   :  { %194 = vsyncadd [#allocation5], 4294967168  ;;  %vm32_vm0 = vcmask 57344   ;;  %v198_v0 = vmov 0.0   ;;  %vm199_vm1 = vmmov 0   ;;  %vm37_vm2 = vcmask 261120  }
   0xe   :  { %33 = vst.msk [vmem:[#allocation2] sm:$0x1] %vm32_vm0, %v198_v0  ;;  %144 = vmatprep.subr.mxu0 %v198_v0  ;;  %146 = vmatprep.mubr.msk.f32.mxu0 %vm199_vm1, %v198_v0  ;;  %v36_v1 = vld [vmem:[#allocation4] sm:$0xff]  ;;  %v35_v2 = vld [vmem:[%s237_s1] sm:$0x1]  ;;  %v122_v7 = vstv %s238_s2  ;;  %s200_s20 = smov [#allocation7]  }
   0xf   :  { %145 = vmatpush3.xpose.msk.msra.mxu0 %vm37_vm2, %v36_v1  ;;  %s131_s21 = sshll.u32 %s200_s20, 4  ;;  %s132_s21 = int_to_ptr.vmem [resolvable:$true] %s131_s21 }
  0x10   :  { %s173_s22 = scalar_lea.vmem %s132_s21, 16  ;;  %s177_s1 = scalar_lea.vmem %s132_s21, 32 }
  0x11   :  { %p174_p5 = scmp.ne.s32.totalorder %s132_s21, %s173_s22  ;;  %p178_p6 = scmp.lt.s32.totalorder %s132_s21, %s132_s21 }
  0x12   :  { %147 = vmatmul.mubr.msk.f32.vlgmr.msra.gmra.mxu0 %vm37_vm2, %v35_v2  ;;  %p179_p7 = scmp.lt.s32.totalorder %s177_s1, %s173_s22 }
  0x14   :  { %p180_p8 = por %p179_p7, %p178_p6 }
  0x15   :  { %v34_v3 = vld [vmem:[#allocation2] sm:$0x1] }
  0x16   :  { %p181_p9 = pnand %p180_p8, %p174_p5 }
  0xd2   :  { %v110_v4 = vpop.f32.mrf.mxu0 }
  0xd3   :  { %v114_v5 = vadd.f32 %v110_v4, %v34_v3 }
  0xd4   :  { %v148_v6 = vpop.f32.mrf.mxu0 }
  0xd5   :  { %116 = vst.msk [vmem:[#allocation2] sm:$0x1] %vm32_vm0, %v114_v5 }
  0xdc   :  { %v120_v8 = vld [vmem:[#allocation2] sm:$0x1] }
  0xdd   :  { %v123_v9 = vadd.f32 %v122_v7, %v120_v8 }
  0xdf   :  { %124 = vst.msk [vmem:[#allocation7] sm:$0x1] %vm32_vm0, %v123_v9 }
  0xe0   :  { %184 = shalt.err (!%p181_p9)
}
  0xe1   :  { %134 = dma.vmem_to_hbm [thread:$0]  %s132_s21, 16, %s239_s3, [#allocation6]  }
  0xe2   :  { %195 = dma.done.wait [#allocation6], 16  }
  0xe3   :  { %196 = vsyncadd [#allocation6], 4294967280 }
  0xe4   :  { %138 = vsyncpa [#allocation5], 1 }
  0xe5   :  { %139 = vsyncpa [#allocation6], 1 }

</bundles_post_ra>
